<compile_context>
chip_gen: v7x
topology: tpu7x:2x2x1
jax: 0.10.0
libtpu: 0.0.40
codegen_flags: <defaults>
</compile_context>

<pallas_src>
import functools
import math

import jax
import jax.numpy as jnp
from jax.experimental import pallas as pl
from jax.experimental.pallas import tpu as pltpu


def _round_up(n, m):
    return ((n + m - 1) // m) * m


def _msvae_kernel(
    # inputs (x/eps batch-blocked; everything else VMEM-resident)
    x_ref, eps_ref,
    we_h_ref, be_h_ref,        # encoder hidden      (D_in, H), (1, H)
    we_ml_ref, be_ml_ref,      # fused mean|logvar   (H, 2L),  (1, 2L)
    wd_h_ref, bd_h_ref,        # decoder hidden      (L, H),   (1, H)
    wd_l_ref, bd_l_ref,        # decoder logits      (H, D*M), (1, D*M)
    gmat_ref,                  # bf16 group sum/value reduction matrix (D*M, 2D)
    # outputs
    logits_ref,                # (TB, D*M) bf16
    misc_ref,                  # (TB, misc_width) f32 = [soft_freq | mean | logvar | 0-pad]
    *, latent_dim, out_dim, misc_width,
):
    f32 = jnp.float32
    bf16 = jnp.bfloat16
    L = latent_dim
    D = out_dim

    # ---------------- Encoder ----------------
    x = x_ref[...]                                                     # already bf16
    h = jnp.dot(x, we_h_ref[...], preferred_element_type=f32) + be_h_ref[...]
    h = jnp.maximum(h, 0.0).astype(bf16)

    ml = jnp.dot(h, we_ml_ref[...], preferred_element_type=f32) + be_ml_ref[...]
    mean = ml[:, :L]
    logvar = ml[:, L:]

    # ---------------- Reparameterize ----------------
    z = mean + eps_ref[...] * jnp.exp(0.5 * logvar)

    # ---------------- Decoder ----------------
    hd = jnp.dot(z.astype(bf16), wd_h_ref[...], preferred_element_type=f32) + bd_h_ref[...]
    hd = jnp.maximum(hd, 0.0).astype(bf16)
    logits = jnp.dot(hd, wd_l_ref[...], preferred_element_type=f32) + bd_l_ref[...]  # (TB, D*M) f32
    logits_ref[...] = logits.astype(logits_ref.dtype)                  # bf16 writeback

    # --------- softmax over groups of M contiguous columns + expected value ---------
    # Shift by the per-row max (softmax is shift-invariant, so this equals the
    # per-group max version up to underflow; a tiny epsilon clamp on the
    # denominator guards the degenerate case).  Group reductions go through the
    # MXU via gmat so the data never leaves its (8,128)-tiled flat layout.
    row_max = jnp.max(logits, axis=-1, keepdims=True)
    e = jnp.exp(logits - row_max)                                      # (TB, D*M) f32
    # TODO(synk): on v6e/v7x the exp itself can run in bf16 (bf16 EUP) for ~2x
    # transcendental throughput; kept in f32 here so the same kernel is optimal
    # on v5e (no bf16 EUP) and to preserve tight soft_freq accuracy.
    red = jnp.dot(e.astype(bf16), gmat_ref[...], preferred_element_type=f32)   # (TB, 2D)
    den = jnp.maximum(red[:, :D], 1e-20)                               # sum_m exp (clamped)
    num = red[:, D:]                                                   # sum_m m*exp
    inv = pl.reciprocal(den, approx=True)                              # EUP slot
    inv = inv * (2.0 - den * inv)                                      # one Newton step
    soft_freq = num * inv                                              # (TB, D)

    # Pack small outputs into one lane-dense slab (single full-width store).
    parts = [soft_freq, mean, logvar]
    pad_w = misc_width - (D + 2 * L)
    if pad_w > 0:
        parts.append(jnp.zeros((soft_freq.shape[0], pad_w), f32))
    misc_ref[...] = jnp.concatenate(parts, axis=-1)


def msvae_forward(x, eps, params, *, max_input_dim, hidden_dim, latent_dim,
                  block_b=1024, logits_dtype=jnp.bfloat16):
    """Runs the MSVAE forward pass. Returns (logits, soft_freq, mean, logvar)."""
    del hidden_dim  # shapes are taken from params
    B = x.shape[0]
    D = max_input_dim          # max_output_dim
    M = max_input_dim          # max_multiplicity
    L = latent_dim
    misc_w = _round_up(D + 2 * L, 128)

    # Batch tile: multiple of 8 sublanes, capped at block_b rows.
    TB = min(_round_up(block_b, 8), _round_up(max(B, 1), 8))
    Bp = _round_up(B, TB)
    # Guarantee >=2 grid steps (when the batch allows it) so the "parallel"
    # batch axis actually shards across both v7x TensorCores.
    if Bp // TB < 2 and Bp > 8:
        TB = max(8, _round_up(pl.cdiv(Bp, 2), 8))
        Bp = _round_up(B, TB)

    bf16 = jnp.bfloat16
    f32 = jnp.float32

    # bf16 x (halves input DMA; it would be cast in-kernel anyway).
    x = x.astype(bf16)
    if Bp != B:
        x = jnp.pad(x, ((0, Bp - B), (0, 0)))
        eps = jnp.pad(eps, ((0, Bp - B), (0, 0)))

    # bf16 weights (MXU-native), f32 biases. Fuse the mean/logvar heads.
    we_h = params["we_h"].astype(bf16)
    be_h = params["be_h"].astype(f32)
    we_ml = jnp.concatenate([params["we_m"], params["we_lv"]], axis=1).astype(bf16)
    be_ml = jnp.concatenate([params["be_m"], params["be_lv"]], axis=1).astype(f32)
    wd_h = params["wd_h"].astype(bf16)
    bd_h = params["bd_h"].astype(f32)
    wd_l = params["wd_l"].astype(bf16)
    bd_l = params["bd_l"].astype(f32)

    # Block-structured reduction matrix for the softmax epilogue:
    #   gmat[d*M + m, d]     = 1   (group sum)
    #   gmat[d*M + m, D + d] = m   (expected-value numerator)
    # Entries 0..M-1 are exact in bf16; bf16 operands make this a single
    # native MXU pass on every generation.
    eye = jnp.eye(D, dtype=f32)
    g_sum = jnp.repeat(eye, M, axis=0)                                  # (D*M, D)
    g_val = g_sum * jnp.tile(jnp.arange(M, dtype=f32), D)[:, None]      # (D*M, D)
    gmat = jnp.concatenate([g_sum, g_val], axis=1).astype(bf16)         # (D*M, 2D)

    kernel = functools.partial(
        _msvae_kernel, latent_dim=L, out_dim=D, misc_width=misc_w)

    def _resident(a):  # full-array block, VMEM-resident across grid steps
        return pl.BlockSpec(a.shape, lambda i: (0,) * a.ndim)

    grid = (pl.cdiv(Bp, TB),)
    in_specs = [
        pl.BlockSpec((TB, x.shape[1]), lambda i: (i, 0)),    # x (bf16)
        pl.BlockSpec((TB, L), lambda i: (i, 0)),             # eps (f32)
        _resident(we_h), _resident(be_h),
        _resident(we_ml), _resident(be_ml),
        _resident(wd_h), _resident(bd_h),
        _resident(wd_l), _resident(bd_l),
        _resident(gmat),
    ]
    out_specs = (
        pl.BlockSpec((TB, D * M), lambda i: (i, 0)),
        pl.BlockSpec((TB, misc_w), lambda i: (i, 0)),
    )
    out_shape = (
        jax.ShapeDtypeStruct((Bp, D * M), logits_dtype),  # logits (flat, lane-dense)
        jax.ShapeDtypeStruct((Bp, misc_w), f32),          # [soft_freq | mean | logvar | pad]
    )

    # TODO(synk): for very large configs (e.g. hidden=512, D=128) on v7x
    # (64 MiB VMEM), add a second "arbitrary" grid axis tiling wd_l / the
    # logits over D*M; on v5e/v6e simply raising vmem_limit_bytes suffices.
    logits_flat, misc = pl.pallas_call(
        kernel,
        out_shape=out_shape,
        grid=grid,
        in_specs=in_specs,
        out_specs=out_specs,
        compiler_params=pltpu.CompilerParams(
            dimension_semantics=("parallel",),      # megacore split on v7x
            vmem_limit_bytes=32 * 1024 * 1024,
        ),
    )(x, eps, we_h, be_h, we_ml, be_ml, wd_h, bd_h, wd_l, bd_l, gmat)

    logits = logits_flat[:B].reshape(B, D, M)
    soft_freq = misc[:B, :D]
    mean = misc[:B, D:D + L]
    logvar = misc[:B, D + L:D + 2 * L]
    return logits, soft_freq, mean, logvar


def init_params(key, max_input_dim, hidden_dim, latent_dim):
    """Uniform(-1/sqrt(fan_in), 1/sqrt(fan_in)) init, like torch.nn.Linear.

    Weights are stored pre-transposed as (in_features, out_features).
    """
    D = max_input_dim
    layers = {
        "e_h": (D, hidden_dim),
        "e_m": (hidden_dim, latent_dim),
        "e_lv": (hidden_dim, latent_dim),
        "d_h": (latent_dim, hidden_dim),
        "d_l": (hidden_dim, D * D),
    }
    params = {}
    keys = jax.random.split(key, 2 * len(layers))
    for idx, (name, (fan_in, fan_out)) in enumerate(layers.items()):
        bound = 1.0 / math.sqrt(float(fan_in))
        params["w" + name] = jax.random.uniform(
            keys[2 * idx], (fan_in, fan_out), jnp.float32, -bound, bound)
        params["b" + name] = jax.random.uniform(
            keys[2 * idx + 1], (1, fan_out), jnp.float32, -bound, bound)
    return params


def msvae_reference(x, eps, p, *, max_input_dim, latent_dim):
    """Pure-JAX reference mirroring the kernel's bf16-operand / f32-accum matmuls."""
    del latent_dim
    D = M = max_input_dim
    bf16 = jnp.bfloat16
    f32 = jnp.float32

    def mm(a, w):
        return jnp.dot(a.astype(bf16), w.astype(bf16), preferred_element_type=f32)

    h = jnp.maximum(mm(x, p["we_h"]) + p["be_h"], 0.0)
    mean = mm(h, p["we_m"]) + p["be_m"]
    logvar = mm(h, p["we_lv"]) + p["be_lv"]
    z = mean + eps * jnp.exp(0.5 * logvar)
    hd = jnp.maximum(mm(z, p["wd_h"]) + p["bd_h"], 0.0)
    logits = (mm(hd, p["wd_l"]) + p["bd_l"]).reshape(x.shape[0], D, M)
    probs = jax.nn.softmax(logits, axis=-1)
    values = jnp.arange(M, dtype=probs.dtype)
    soft_freq = jnp.sum(probs * values, axis=-1)
    return logits, soft_freq, mean, logvar


def _validate(B, key, params, max_input_dim, hidden_dim, latent_dim):
    k_x, k_eps = jax.random.split(key, 2)
    x = jax.random.normal(k_x, (B, max_input_dim), dtype=jnp.float32)
    eps = jax.random.normal(k_eps, (B, latent_dim), dtype=jnp.float32)

    logits, soft_freq, mean, logvar = msvae_forward(
        x, eps, params,
        max_input_dim=max_input_dim, hidden_dim=hidden_dim, latent_dim=latent_dim,
    )
    jax.block_until_ready((logits, soft_freq, mean, logvar))

    r_logits, r_soft, r_mean, r_logvar = msvae_reference(
        x, eps, params, max_input_dim=max_input_dim, latent_dim=latent_dim)

    assert logits.shape == (B, max_input_dim, max_input_dim)
    assert soft_freq.shape == (B, max_input_dim)
    assert mean.shape == (B, latent_dim) and logvar.shape == (B, latent_dim)
    # logits are stored in bf16 (HBM writeback halved) -> tolerance reflects
    # bf16 quantization of values O(0.3); soft_freq uses bf16 exp operands for
    # the MXU group-reduction dot (f32 accumulation), ~0.4% worst-case relative.
    assert jnp.allclose(logits.astype(jnp.float32), r_logits, atol=1e-2, rtol=1e-2)
    assert jnp.allclose(soft_freq, r_soft, atol=1e-2, rtol=1e-2)
    assert jnp.allclose(mean, r_mean, atol=1e-3, rtol=1e-3)
    assert jnp.allclose(logvar, r_logvar, atol=1e-3, rtol=1e-3)


if __name__ == "__main__":
    # Small shapes consistent with the module.
    MAX_INPUT_DIM = 16   # decoder logits layer out = 16*16 = 256
    HIDDEN_DIM = 32
    LATENT_DIM = 8

    root = jax.random.PRNGKey(0)
    k_params, k_small, k_multi = jax.random.split(root, 3)
    params = init_params(k_params, MAX_INPUT_DIM, HIDDEN_DIM, LATENT_DIM)

    # Tiny batch (single tile) ...
    _validate(2, k_small, params, MAX_INPUT_DIM, HIDDEN_DIM, LATENT_DIM)
    # ... and a batch large enough to exercise the multi-tile grid + padding
    # (and the >=2-grid-step megacore path).
    _validate(40, k_multi, params, MAX_INPUT_DIM, HIDDEN_DIM, LATENT_DIM)

    print("KERNEL_OK")
</pallas_src>

<mosaic_0001>
module attributes {stable_mosaic.version = 11 : i64} {
  func.func @_msvae_kernel(%arg0: i32, %arg1: memref<8x16xbf16, #tpu.memory_space<vmem>>, %arg2: memref<8x8xf32, #tpu.memory_space<vmem>>, %arg3: memref<16x32xbf16, #tpu.memory_space<vmem>>, %arg4: memref<1x32xf32, #tpu.memory_space<vmem>>, %arg5: memref<32x16xbf16, #tpu.memory_space<vmem>>, %arg6: memref<1x16xf32, #tpu.memory_space<vmem>>, %arg7: memref<8x32xbf16, #tpu.memory_space<vmem>>, %arg8: memref<1x32xf32, #tpu.memory_space<vmem>>, %arg9: memref<32x256xbf16, #tpu.memory_space<vmem>>, %arg10: memref<1x256xf32, #tpu.memory_space<vmem>>, %arg11: memref<256x32xbf16, #tpu.memory_space<vmem>>, %arg12: memref<8x256xbf16, #tpu.memory_space<vmem>>, %arg13: memref<8x128xf32, #tpu.memory_space<vmem>>) attributes {dimension_semantics = [#tpu.dimension_semantics<parallel>], iteration_bounds = array<i64: 1>, scalar_prefetch = 0 : i64, scratch_operands = 0 : i64, tpu.core_type = #tpu.core_type<tc>, window_params = [{transform_indices = @transform_0, window_bounds = array<i64: 8, 16>}, {transform_indices = @transform_1, window_bounds = array<i64: 8, 8>}, {pipeline_mode = #tpu.pipeline_mode<synchronous>, transform_indices = @transform_2, window_bounds = array<i64: 16, 32>}, {pipeline_mode = #tpu.pipeline_mode<synchronous>, transform_indices = @transform_3, window_bounds = array<i64: 1, 32>}, {pipeline_mode = #tpu.pipeline_mode<synchronous>, transform_indices = @transform_4, window_bounds = array<i64: 32, 16>}, {pipeline_mode = #tpu.pipeline_mode<synchronous>, transform_indices = @transform_5, window_bounds = array<i64: 1, 16>}, {pipeline_mode = #tpu.pipeline_mode<synchronous>, transform_indices = @transform_6, window_bounds = array<i64: 8, 32>}, {pipeline_mode = #tpu.pipeline_mode<synchronous>, transform_indices = @transform_7, window_bounds = array<i64: 1, 32>}, {pipeline_mode = #tpu.pipeline_mode<synchronous>, transform_indices = @transform_8, window_bounds = array<i64: 32, 256>}, {pipeline_mode = #tpu.pipeline_mode<synchronous>, transform_indices = @transform_9, window_bounds = array<i64: 1, 256>}, {pipeline_mode = #tpu.pipeline_mode<synchronous>, transform_indices = @transform_10, window_bounds = array<i64: 256, 32>}, {transform_indices = @transform_11, window_bounds = array<i64: 8, 256>}, {transform_indices = @transform_12, window_bounds = array<i64: 8, 128>}]} {
    %c0 = arith.constant 0 : index
    %c0_0 = arith.constant 0 : index
    %0 = vector.load %arg1[%c0, %c0_0] : memref<8x16xbf16, #tpu.memory_space<vmem>>, vector<8x16xbf16>
    %c0_1 = arith.constant 0 : index
    %c0_2 = arith.constant 0 : index
    %1 = vector.load %arg3[%c0_1, %c0_2] : memref<16x32xbf16, #tpu.memory_space<vmem>>, vector<16x32xbf16>
    %cst = arith.constant dense<0.000000e+00> : vector<8x32xf32>
    %2 = tpu.matmul %0, %1, %cst {dimension_numbers = #tpu.dot_dimension_numbers<[1], [0], [0], [1], [0, 0, 1, 1], [], []>} : vector<8x16xbf16>, vector<16x32xbf16>, vector<8x32xf32> -> vector<8x32xf32>
    %c0_3 = arith.constant 0 : index
    %c0_4 = arith.constant 0 : index
    %3 = vector.load %arg4[%c0_3, %c0_4] : memref<1x32xf32, #tpu.memory_space<vmem>>, vector<1x32xf32>
    %4 = vector.broadcast %3 : vector<1x32xf32> to vector<8x32xf32>
    %5 = arith.addf %2, %4 : vector<8x32xf32>
    %cst_5 = arith.constant 0.000000e+00 : f32
    %6 = vector.broadcast %cst_5 : f32 to vector<8x32xf32>
    %7 = arith.maximumf %5, %6 : vector<8x32xf32>
    %8 = arith.truncf %7 : vector<8x32xf32> to vector<8x32xbf16>
    %c0_6 = arith.constant 0 : index
    %c0_7 = arith.constant 0 : index
    %9 = vector.load %arg5[%c0_6, %c0_7] : memref<32x16xbf16, #tpu.memory_space<vmem>>, vector<32x16xbf16>
    %cst_8 = arith.constant dense<0.000000e+00> : vector<8x16xf32>
    %10 = tpu.matmul %8, %9, %cst_8 {dimension_numbers = #tpu.dot_dimension_numbers<[1], [0], [0], [1], [0, 0, 1, 1], [], []>} : vector<8x32xbf16>, vector<32x16xbf16>, vector<8x16xf32> -> vector<8x16xf32>
    %c0_9 = arith.constant 0 : index
    %c0_10 = arith.constant 0 : index
    %11 = vector.load %arg6[%c0_9, %c0_10] : memref<1x16xf32, #tpu.memory_space<vmem>>, vector<1x16xf32>
    %12 = vector.broadcast %11 : vector<1x16xf32> to vector<8x16xf32>
    %13 = arith.addf %10, %12 : vector<8x16xf32>
    %14 = vector.extract_strided_slice %13 {offsets = [0, 0], sizes = [8, 8], strides = [1, 1]} : vector<8x16xf32> to vector<8x8xf32>
    %15 = vector.extract_strided_slice %13 {offsets = [0, 8], sizes = [8, 8], strides = [1, 1]} : vector<8x16xf32> to vector<8x8xf32>
    %c0_11 = arith.constant 0 : index
    %c0_12 = arith.constant 0 : index
    %16 = vector.load %arg2[%c0_11, %c0_12] : memref<8x8xf32, #tpu.memory_space<vmem>>, vector<8x8xf32>
    %cst_13 = arith.constant 5.000000e-01 : f32
    %17 = vector.broadcast %cst_13 : f32 to vector<8x8xf32>
    %18 = arith.mulf %17, %15 : vector<8x8xf32>
    %19 = math.exp %18 : vector<8x8xf32>
    %20 = arith.mulf %16, %19 : vector<8x8xf32>
    %21 = arith.addf %14, %20 : vector<8x8xf32>
    %22 = arith.truncf %21 : vector<8x8xf32> to vector<8x8xbf16>
    %c0_14 = arith.constant 0 : index
    %c0_15 = arith.constant 0 : index
    %23 = vector.load %arg7[%c0_14, %c0_15] : memref<8x32xbf16, #tpu.memory_space<vmem>>, vector<8x32xbf16>
    %cst_16 = arith.constant dense<0.000000e+00> : vector<8x32xf32>
    %24 = tpu.matmul %22, %23, %cst_16 {dimension_numbers = #tpu.dot_dimension_numbers<[1], [0], [0], [1], [0, 0, 1, 1], [], []>} : vector<8x8xbf16>, vector<8x32xbf16>, vector<8x32xf32> -> vector<8x32xf32>
    %c0_17 = arith.constant 0 : index
    %c0_18 = arith.constant 0 : index
    %25 = vector.load %arg8[%c0_17, %c0_18] : memref<1x32xf32, #tpu.memory_space<vmem>>, vector<1x32xf32>
    %26 = vector.broadcast %25 : vector<1x32xf32> to vector<8x32xf32>
    %27 = arith.addf %24, %26 : vector<8x32xf32>
    %cst_19 = arith.constant 0.000000e+00 : f32
    %28 = vector.broadcast %cst_19 : f32 to vector<8x32xf32>
    %29 = arith.maximumf %27, %28 : vector<8x32xf32>
    %30 = arith.truncf %29 : vector<8x32xf32> to vector<8x32xbf16>
    %c0_20 = arith.constant 0 : index
    %c0_21 = arith.constant 0 : index
    %31 = vector.load %arg9[%c0_20, %c0_21] : memref<32x256xbf16, #tpu.memory_space<vmem>>, vector<32x256xbf16>
    %cst_22 = arith.constant dense<0.000000e+00> : vector<8x256xf32>
    %32 = tpu.matmul %30, %31, %cst_22 {dimension_numbers = #tpu.dot_dimension_numbers<[1], [0], [0], [1], [0, 0, 1, 1], [], []>} : vector<8x32xbf16>, vector<32x256xbf16>, vector<8x256xf32> -> vector<8x256xf32>
    %c0_23 = arith.constant 0 : index
    %c0_24 = arith.constant 0 : index
    %33 = vector.load %arg10[%c0_23, %c0_24] : memref<1x256xf32, #tpu.memory_space<vmem>>, vector<1x256xf32>
    %34 = vector.broadcast %33 : vector<1x256xf32> to vector<8x256xf32>
    %35 = arith.addf %32, %34 : vector<8x256xf32>
    %36 = arith.truncf %35 : vector<8x256xf32> to vector<8x256xbf16>
    %c0_25 = arith.constant 0 : index
    %c0_26 = arith.constant 0 : index
    %37 = vector.load %arg12[%c0_25, %c0_26] : memref<8x256xbf16, #tpu.memory_space<vmem>>, vector<8x256xbf16>
    tpu.vector_store %arg12[%c0_25, %c0_26], %36 {strides = array<i32>} : memref<8x256xbf16, #tpu.memory_space<vmem>>, vector<8x256xbf16>,
    %cst_27 = arith.constant dense<0xFF800000> : vector<8xf32>
    %38 = vector.multi_reduction <maximumf>, %35, %cst_27 [1] : vector<8x256xf32> to vector<8xf32>
    %39 = vector.shape_cast %38 : vector<8xf32> to vector<8x1xf32>
    %40 = vector.broadcast %39 : vector<8x1xf32> to vector<8x256xf32>
    %41 = arith.subf %35, %40 : vector<8x256xf32>
    %42 = math.exp %41 : vector<8x256xf32>
    %43 = arith.truncf %42 : vector<8x256xf32> to vector<8x256xbf16>
    %c0_28 = arith.constant 0 : index
    %c0_29 = arith.constant 0 : index
    %44 = vector.load %arg11[%c0_28, %c0_29] : memref<256x32xbf16, #tpu.memory_space<vmem>>, vector<256x32xbf16>
    %cst_30 = arith.constant dense<0.000000e+00> : vector<8x32xf32>
    %45 = tpu.matmul %43, %44, %cst_30 {dimension_numbers = #tpu.dot_dimension_numbers<[1], [0], [0], [1], [0, 0, 1, 1], [], []>} : vector<8x256xbf16>, vector<256x32xbf16>, vector<8x32xf32> -> vector<8x32xf32>
    %46 = vector.extract_strided_slice %45 {offsets = [0, 0], sizes = [8, 16], strides = [1, 1]} : vector<8x32xf32> to vector<8x16xf32>
    %cst_31 = arith.constant 9.99999968E-21 : f32
    %47 = vector.broadcast %cst_31 : f32 to vector<8x16xf32>
    %48 = arith.maximumf %46, %47 : vector<8x16xf32>
    %49 = vector.extract_strided_slice %45 {offsets = [0, 16], sizes = [8, 16], strides = [1, 1]} : vector<8x32xf32> to vector<8x16xf32>
    %50 = tpu.reciprocal %48 {approx = true} : vector<8x16xf32> -> vector<8x16xf32>
    %51 = arith.mulf %48, %50 : vector<8x16xf32>
    %cst_32 = arith.constant 2.000000e+00 : f32
    %52 = vector.broadcast %cst_32 : f32 to vector<8x16xf32>
    %53 = arith.subf %52, %51 : vector<8x16xf32>
    %54 = arith.mulf %50, %53 : vector<8x16xf32>
    %55 = arith.mulf %49, %54 : vector<8x16xf32>
    %cst_33 = arith.constant 0.000000e+00 : f32
    %56 = vector.broadcast %cst_33 : f32 to vector<8x96xf32>
    %57 = tpu.concatenate %55, %14, %15, %56 in 1 : vector<8x16xf32>, vector<8x8xf32>, vector<8x8xf32>, vector<8x96xf32> -> vector<8x128xf32>
    %c0_34 = arith.constant 0 : index
    %c0_35 = arith.constant 0 : index
    %58 = vector.load %arg13[%c0_34, %c0_35] : memref<8x128xf32, #tpu.memory_space<vmem>>, vector<8x128xf32>
    tpu.vector_store %arg13[%c0_34, %c0_35], %57 {strides = array<i32>} : memref<8x128xf32, #tpu.memory_space<vmem>>, vector<8x128xf32>,
    return
  }
  func.func @transform_0(%arg0: i32) -> (i32, i32) {
    %c0_i32 = arith.constant 0 : i32
    %c0_i32_0 = arith.constant 0 : i32
    return %arg0, %c0_i32 : i32, i32
  }
  func.func @transform_1(%arg0: i32) -> (i32, i32) {
    %c0_i32 = arith.constant 0 : i32
    %c0_i32_0 = arith.constant 0 : i32
    return %arg0, %c0_i32 : i32, i32
  }
  func.func @transform_2(%arg0: i32) -> (i32, i32) {
    %c0_i32 = arith.constant 0 : i32
    %c0_i32_0 = arith.constant 0 : i32
    %c0_i32_1 = arith.constant 0 : i32
    return %c0_i32, %c0_i32_0 : i32, i32
  }
  func.func @transform_3(%arg0: i32) -> (i32, i32) {
    %c0_i32 = arith.constant 0 : i32
    %c0_i32_0 = arith.constant 0 : i32
    %c0_i32_1 = arith.constant 0 : i32
    return %c0_i32, %c0_i32_0 : i32, i32
  }
  func.func @transform_4(%arg0: i32) -> (i32, i32) {
    %c0_i32 = arith.constant 0 : i32
    %c0_i32_0 = arith.constant 0 : i32
    %c0_i32_1 = arith.constant 0 : i32
    return %c0_i32, %c0_i32_0 : i32, i32
  }
  func.func @transform_5(%arg0: i32) -> (i32, i32) {
    %c0_i32 = arith.constant 0 : i32
    %c0_i32_0 = arith.constant 0 : i32
    %c0_i32_1 = arith.constant 0 : i32
    return %c0_i32, %c0_i32_0 : i32, i32
  }
  func.func @transform_6(%arg0: i32) -> (i32, i32) {
    %c0_i32 = arith.constant 0 : i32
    %c0_i32_0 = arith.constant 0 : i32
    %c0_i32_1 = arith.constant 0 : i32
    return %c0_i32, %c0_i32_0 : i32, i32
  }
  func.func @transform_7(%arg0: i32) -> (i32, i32) {
    %c0_i32 = arith.constant 0 : i32
    %c0_i32_0 = arith.constant 0 : i32
    %c0_i32_1 = arith.constant 0 : i32
    return %c0_i32, %c0_i32_0 : i32, i32
  }
  func.func @transform_8(%arg0: i32) -> (i32, i32) {
    %c0_i32 = arith.constant 0 : i32
    %c0_i32_0 = arith.constant 0 : i32
    %c0_i32_1 = arith.constant 0 : i32
    return %c0_i32, %c0_i32_0 : i32, i32
  }
  func.func @transform_9(%arg0: i32) -> (i32, i32) {
    %c0_i32 = arith.constant 0 : i32
    %c0_i32_0 = arith.constant 0 : i32
    %c0_i32_1 = arith.constant 0 : i32
    return %c0_i32, %c0_i32_0 : i32, i32
  }
  func.func @transform_10(%arg0: i32) -> (i32, i32) {
    %c0_i32 = arith.constant 0 : i32
    %c0_i32_0 = arith.constant 0 : i32
    %c0_i32_1 = arith.constant 0 : i32
    return %c0_i32, %c0_i32_0 : i32, i32
  }
  func.func @transform_11(%arg0: i32) -> (i32, i32) {
    %c0_i32 = arith.constant 0 : i32
    %c0_i32_0 = arith.constant 0 : i32
    return %arg0, %c0_i32 : i32, i32
  }
  func.func @transform_12(%arg0: i32) -> (i32, i32) {
    %c0_i32 = arith.constant 0 : i32
    %c0_i32_0 = arith.constant 0 : i32
    return %arg0, %c0_i32 : i32, i32
  }
}

</mosaic_0001>

<bundles_post_ra>
// kernel: tpu_custom_call.1
= control target key start
LH: loop header
LB: loop body
LE: loop exit
PB: predicated region body
PF: predicated region fallthrough
CT: control target
= control target key end

     0   :  { %18 = vsyncpa [#allocation3], 0  ;;  %v730_v1 = vmov 0.0   ;;  %vm731_vm0 = vmmov 0   ;;  %vm59_vm1 = vcmask 130048   ;;  %s930_s0 = inlined_call_operand.vmem [shape: bf16[8,16], index: 0, kind: input, shape index: {}]   ;;  %s931_s1 = inlined_call_operand.vmem [shape: f32[8,8], index: 1, kind: input, shape index: {}]   ;;  %s932_s2 = inlined_call_operand.vmem [shape: bf16[16,32], index: 2, kind: input, shape index: {}]   ;;  %s933_s3 = inlined_call_operand.vmem [shape: f32[1,32], index: 3, kind: input, shape index: {}]   ;;  %s934_s4 = inlined_call_operand.vmem [shape: bf16[32,16], index: 4, kind: input, shape index: {}]   ;;  %s935_s5 = inlined_call_operand.vmem [shape: f32[1,16], index: 5, kind: input, shape index: {}]   ;;  %s936_s6 = inlined_call_operand.vmem [shape: bf16[8,32], index: 6, kind: input, shape index: {}]   ;;  %s937_s7 = inlined_call_operand.vmem [shape: f32[1,32], index: 7, kind: input, shape index: {}]   ;;  %s938_s8 = inlined_call_operand.vmem [shape: bf16[32,256], index: 8, kind: input, shape index: {}]   ;;  %s939_s9 = inlined_call_operand.vmem [shape: f32[1,256], index: 9, kind: input, shape index: {}]   ;;  %s940_s10 = inlined_call_operand.vmem [shape: bf16[256,32], index: 10, kind: input, shape index: {}]   ;;  %s941_s11 = inlined_call_operand.hbm [shape: bf16[8,256], index: 11, kind: output, shape index: {0}]   ;;  %s942_s12 = inlined_call_operand.hbm [shape: f32[8,128], index: 12, kind: output, shape index: {1}]  }
   0x1   :  { %v649_v0 = vld [vmem:[%s932_s2] sm:$0xff]   ;;  %621 = vmatprep.subr.bf16.mxu1 %v730_v1  ;;  %623 = vmatprep.mubr.msk.bf16.mxu1 %vm731_vm0, %v730_v1 }
   0x2   :  { %622 = vmatpush3.bf16.msra.mxu1 %v649_v0  ;;  %v43_v2 = vld [vmem:[%s930_s0] sm:$0xf] }
   0x3   :  { %v650_v3 = vld [vmem:[%s934_s4] sm:$0xff]   ;;  %627 = vmatprep.subr.bf16.mxu1 %v730_v1 }
   0x5   :  { %624 = vmatmul.mubr.msk.bf16.vlgmr.msra.gmra.mrb[0].mxu1 %vm59_vm1, %v43_v2 }
   0x6   :  { %628 = vmatpush3.bf16.msra.mxu1 %v650_v3  ;;  %631 = vmatprep.mubr.msk.bf16.mxu1 %vm731_vm0, %v730_v1 }
   0x7   :  { %629 = vmatprep.subr.bf16.mxu1 %v730_v1 }
   0x8   :  { %19 = vsyncpa [#allocation5], 0  ;;  %v651_v4 = vld [vmem:[%s934_s4 + $0x8] sm:$0xff]   ;;  %v560_v5 = vld [vmem:[%s933_s3] ss:$0 sm:$0xff]  ;;  %vm128_vm2 = vcmask 261120   ;;  %v247_v50 = vlaneseq }
   0x9   :  { %v183_v13 = vld [vmem:[%s936_s6] sm:$0xf]  ;;  %vm195_vm3 = vcmask 1043456   ;;  %v654_v23 = vld [vmem:[%s938_s8 + $0x4] ss:$8 sps:$4 sm:$0xff]   ;;  %s732_s6 = smov 120  }
   0xa   :  { %630 = vmatpush3.bf16.msra.mxu1 %v651_v4  ;;  %v197_v14 = vsel %vm195_vm3, %v183_v13, 0  ;;  %v563_v15 = vld [vmem:[%s935_s5] ss:$0 sm:$0xff]  ;;  %vm191_vm4 = vcmask 64512   ;;  %v657_v31 = vld [vmem:[%s938_s8 + $0x14] ss:$8 sps:$4 sm:$0xff]  }
   0xb   :  { %635 = vmatprep.subr.bf16.mxu1 %v730_v1  ;;  %v172_v25 = vld [vmem:[%s931_s1] sm:$0xff]  ;;  %v655_v32 = vld [vmem:[%s938_s8 + $0x10] ss:$8 sps:$4 sm:$0xff]   ;;  %v733_v33 = vmov 0   ;;  %v660_v44 = vld [vmem:[%s940_s10 + $0x48] sm:$0xff]   ;;  %v248_v51 = vshrl.u32 %v247_v50, 7 }
   0xc   :  { %v652_v29 = vld [vmem:[%s938_s8] ss:$8 sps:$4 sm:$0xff]   ;;  %v662_v46 = vld [vmem:[%s940_s10 + $0x50] sm:$0xff]   ;;  %v664_v48 = vld [vmem:[%s940_s10 + $0x58] sm:$0xff]  }
   0xd   :  { %v567_v34 = vld [vmem:[%s937_s7] ss:$0 sm:$0xff]  ;;  %v661_v45 = vld [vmem:[%s940_s10 + $0x8] sm:$0xff]   ;;  %v663_v47 = vld [vmem:[%s940_s10 + $0x10] sm:$0xff]   ;;  %v249_v52 = vsub.s32 0, %v248_v51  ;;  %v253_v54 = vsub.s32 1, %v248_v51 }
   0xe   :  { %v658_v42 = vld [vmem:[%s940_s10 + $0x40] sm:$0xff]   ;;  %v665_v49 = vld [vmem:[%s940_s10 + $0x18] sm:$0xff]   ;;  %v668_v3 = vld [vmem:[%s940_s10 + $0x68] sm:$0xff]   ;;  %s735_s7 = smov [#allocation2]  }
   0xf   :  { %v659_v43 = vld [vmem:[%s940_s10] sm:$0xff]   ;;  %599 = vmatprep.subr.bf16.mxu0 %v658_v42  ;;  %v669_v4 = vld [vmem:[%s940_s10 + $0x28] sm:$0xff]   ;;  %s538_s27 = sshll.u32 %s735_s7, 4  ;;  %s539_s27 = int_to_ptr.vmem [resolvable:$true] %s538_s27 }
  0x10   :  { %600 = vmatpush3.bf16.msra.mxu0 %v659_v43  ;;  %v245_v53 = vld [vmem:[%s939_s9] sm:$0x3]  ;;  %s682_s0 = scalar_lea.vmem %s539_s27, 128  ;;  %p687_p1 = scmp.lt.s32.totalorder %s539_s27, %s539_s27 }
  0x11   :  { %601 = vmatprep.subr.bf16.mxu0 %v660_v44  ;;  %v250_v55 = vrot.slane %v245_v53, %v249_v52  ;;  %v254_v56 = vrot.slane %v245_v53, %v253_v54  ;;  %v667_v2 = vld [vmem:[%s940_s10 + $0x20] sm:$0xff]   ;;  %p683_p0 = scmp.ne.s32.totalorder %s539_s27, %s682_s0  ;;  %p688_p2 = scmp.lt.s32.totalorder %s682_s0, %s682_s0 }
  0x13   :  { %p689_p3 = por %p688_p2, %p687_p1 }
  0x14   :  { %602 = vmatpush3.bf16.msra.mxu0 %v661_v45 }
  0x15   :  { %603 = vmatprep.subr.bf16.mxu0 %v662_v46  ;;  %p690_p4 = pnand %p689_p3, %p683_p0 }
  0x18   :  { %604 = vmatpush3.bf16.msra.mxu0 %v663_v47 }
  0x19   :  { %605 = vmatprep.subr.bf16.mxu0 %v664_v48 }
  0x1c   :  { %606 = vmatpush3.bf16.msra.mxu0 %v665_v49 }
  0xd8   :  { %v97_v6 = vpop.f32.mrb[0].mxu1 }
  0xd9   :  { %v98_v7 = vadd.f32 %v560_v5, %v97_v6  ;;  %v625_v8 = vpop.f32.mrb[1].mxu1  ;;  %v670_v5 = vld [vmem:[%s940_s10 + $0x70] sm:$0xff]  }
  0xda   :  { %v100_v9 = vpop.f32.mrb[2].mxu1  ;;  %v671_v6 = vld [vmem:[%s940_s10 + $0x30] sm:$0xff]   ;;  %v673_v8 = vld [vmem:[%s940_s10 + $0x38] sm:$0xff]  }
  0xdb   :  { %v103_v10 = vmax.f32 %v98_v7, 0.0  ;;  %v626_v11 = vpop.f32.mrb[3].mxu1  ;;  %v672_v7 = vld [vmem:[%s940_s10 + $0x78] sm:$0xff]  }
  0xdd   :  { %v104_v12 = vpack.c.bf16 %v103_v10, %v103_v10 }
  0xdf   :  { %632 = vmatmul.mubr.msk.bf16.vlgmr.msra.gmra.mrb[4].mxu1 %vm128_vm2, %v104_v12 }
  0xe0   :  { %637 = vmatprep.mubr.msk.bf16.mxu1 %vm731_vm0, %v730_v1  ;;  %636 = vmatpush3.bf16.msra.mxu1 %v197_v14  ;;  %v666_v1 = vld [vmem:[%s940_s10 + $0x60] sm:$0xff]   ;;  %s734_s10 = smov 16  }
  0xe1   :  { %280 = vmatprep.subr.bf16.mxu1 %v654_v23  ;;  %607 = vmatprep.subr.bf16.mxu0 %v666_v1 }
  0xe2   :  { %608 = vmatpush3.bf16.msra.mxu0 %v667_v2 }
  0xe3   :  { %609 = vmatprep.subr.bf16.mxu0 %v668_v3 }
  0xe6   :  { %610 = vmatpush3.bf16.msra.mxu0 %v669_v4 }
  0xe7   :  { %611 = vmatprep.subr.bf16.mxu0 %v670_v5 }
  0xea   :  { %612 = vmatpush3.bf16.msra.mxu0 %v671_v6 }
  0xeb   :  { %613 = vmatprep.subr.bf16.mxu0 %v672_v7 }
  0xee   :  { %614 = vmatpush3.bf16.msra.mxu0 %v673_v8 }
 0x1b2   :  { %v166_v16 = vpop.f32.mrb[4].mxu1 }
 0x1b3   :  { %v829_v17 = vadd.f32 %v563_v15, %v166_v16  ;;  %v633_v18 = vpop.f32.mrb[5].mxu1 }
 0x1b4   :  { %v169_v19 = vpop.f32.mrb[6].mxu1 }
 0x1b5   :  { %v173_v20 = vmul.f32 0.5, %v829_v17  ;;  %v634_v21 = vpop.f32.mrb[7].mxu1 }
 0x1b7   :  { %v174_v22 = vmul.f32 1.442695, %v173_v20 }
 0x1b9   :  { %674 = vpow2.f32 %v174_v22 }
 0x1c3   :  { %v675_v24 = vpop.eup %674 }
 0x1c4   :  { %177 = vrot.lane.b32.xlu0 %v675_v24, %s732_s6 }
 0x236   :  { %v178_v26 = vpop.permute.xlu0 %177 }
 0x237   :  { %v180_v27 = vmul.f32 %v178_v26, %v172_v25 }
 0x239   :  { %v181_v28 = vadd.f32 %v180_v27, %v829_v17 }
 0x23b   :  { %v182_v30 = vpack.c.bf16 %v181_v28, %v181_v28 }
 0x23d   :  { %638 = vmatmul.mubr.msk.bf16.vlgmr.msra.gmra.mrb[8].mxu1 %vm191_vm4, %v182_v30 }
 0x23e   :  { %281 = vmatpush1.bf16.msra.mxu1 %v652_v29  ;;  %312 = vmatprep.mubr.bf16.mxu1 %v733_v33 }
 0x23f   :  { %282 = vmatprep.subr.bf16.mxu1 %v657_v31 }
 0x242   :  { %283 = vmatpush1.bf16.msra.mxu1 %v655_v32 }
 0x310   :  { %v233_v35 = vpop.f32.mrb[8].mxu1 }
 0x311   :  { %v234_v36 = vadd.f32 %v567_v34, %v233_v35  ;;  %v639_v37 = vpop.f32.mrb[9].mxu1 }
 0x312   :  { %v236_v38 = vpop.f32.mrb[10].mxu1 }
 0x313   :  { %v239_v39 = vmax.f32 %v234_v36, 0.0  ;;  %v640_v40 = vpop.f32.mrb[11].mxu1 }
 0x315   :  { %v240_v41 = vpack.c.bf16 %v239_v39, %v239_v39 }
 0x317   :  { %573 = vmatmul.mubr.msk.bf16.vlgmr.msra.gmra.mrb[12].mxu1 %vm128_vm2, %v240_v41 }
 0x3ea   :  { %v314_v57 = vpop.f32.mrb[12].mxu1 }
 0x3eb   :  { %v315_v58 = vadd.f32 %v314_v57, %v250_v55  ;;  %v316_v59 = vpop.f32.mrb[13].mxu1 }
 0x3ec   :  { %v317_v60 = vadd.f32 %v316_v59, %v254_v56  ;;  %v318_v61 = vpop.f32.mrb[14].mxu1 }
 0x3ed   :  { %v319_v62 = vpop.f32.mrb[15].mxu1 }
 0x3ee   :  { %v330_v63 = vmax.f32 %v315_v58, %v317_v60  ;;  %v591_v0 = vpack.c.bf16 %v317_v60, %v315_v58 }
 0x3f0   :  { %331 = vmax.xlane.f32.xlu0 %v330_v63  ;;  %329 = vst [vmem:[#allocation2] sm:$0xff] %v591_v0 }
 0x47d   :  { %v332_v9 = vpop.xlane.xlu0 %331 }
 0x47e   :  { %v333_v10 = vsub.f32 %v315_v58, %v332_v9  ;;  %v334_v11 = vsub.f32 %v317_v60, %v332_v9 }
 0x480   :  { %v335_v12 = vmul.f32 1.442695, %v333_v10  ;;  %v337_v13 = vmul.f32 1.442695, %v334_v11 }
 0x482   :  { %676 = vpow2.f32 %v335_v12 }
 0x483   :  { %678 = vpow2.f32 %v337_v13 }
 0x48c   :  { %v677_v14 = vpop.eup %676 }
 0x48d   :  { %v679_v15 = vpop.eup %678  ;;  %v339_v16 = vpack.c.bf16 %v677_v14, %v677_v14 }
 0x48e   :  { %v340_v18 = vpack.c.bf16 %v679_v15, %v679_v15 }
 0x490   :  { %501 = vmatprep.mubr.bf16.mxu0 %v340_v18 }
 0x491   :  { %502 = vmatmul.mubr.bf16.vlgmr.msra.gmra.mrb[0].mxu0 %v339_v16 }
 0x564   :  { %v615_v19 = vpop.f32.mrb[0].mxu0 }
 0x565   :  { %v616_v20 = vpop.f32.mrb[1].mxu0 }
 0x566   :  { %v617_v21 = vadd.f32 %v616_v20, %v615_v19  ;;  %v618_v22 = vpop.f32.mrb[2].mxu0 }
 0x567   :  { %v619_v23 = vpop.f32.mrb[3].mxu0 }
 0x568   :  { %v509_v24 = vmax.f32 %v617_v21, 1e-20 }
 0x56a   :  { %680 = vrcp.f32 %v509_v24 }
 0x574   :  { %v681_v25 = vpop.eup %680 }
 0x575   :  { %v511_v26 = vmul.f32 %v681_v25, %v509_v24 }
 0x577   :  { %v512_v27 = vsub.f32 2.0, %v511_v26 }
 0x579   :  { %v513_v28 = vmul.f32 %v681_v25, %v512_v27 }
 0x57b   :  { %515 = vrot.lane.b32.xlu1 %v513_v28, %s734_s10 }
 0x57c   :  { %693 = shalt.err (!%p690_p4)
}
 0x57d   :  { %s694_s4 = scalar_lea.hbm %s941_s11, 128 }
 0x57e   :  { %p695_p5 = scmp.ne.s32.totalorder %s941_s11, %s694_s4  ;;  %p698_p6 = scmp.lt.u32.totalorder %s694_s4, %s941_s11 }
 0x580   :  { %p700_p7 = pnand %p698_p6, %p695_p5 }
 0x582   :  { %703 = shalt.err (!%p700_p7)
}
 0x583   :  { %541 = dma.vmem_to_hbm [thread:$0]  %s539_s27, 128, %s941_s11, [#allocation3]   ;;  %vm528_vm5 = vcmask 195584  }
 0x584   :  { %s736_s5 = smov 112   ;;  %s737_s16 = smov [#allocation4]  }
 0x585   :  { %s548_s17 = sshll.u32 %s737_s16, 4  ;;  %s549_s17 = int_to_ptr.vmem [resolvable:$true] %s548_s17 }
 0x586   :  { %s704_s18 = scalar_lea.vmem %s549_s17, 128  ;;  %p709_p9 = scmp.lt.s32.totalorder %s549_s17, %s549_s17 }
 0x587   :  { %p705_p8 = scmp.ne.s32.totalorder %s549_s17, %s704_s18  ;;  %p710_p10 = scmp.lt.s32.totalorder %s704_s18, %s704_s18 }
 0x589   :  { %p711_p11 = por %p710_p10, %p709_p9 }
 0x58b   :  { %p712_p12 = pnand %p711_p11, %p705_p8 }
 0x5ed   :  { %v516_v29 = vpop.permute.xlu1 %515 }
 0x5ee   :  { %v518_v30 = vmul.f32 %v617_v21, %v516_v29 }
 0x5f0   :  { %520 = vrot.lane.b32.xlu1 %v518_v30, %s736_s5 }
 0x5f4   :  { %524 = vrot.lane.b32.xlu1 %v829_v17, %s734_s10 }
 0x662   :  { %v521_v31 = vpop.permute.xlu1 %520 }
 0x666   :  { %v525_v32 = vpop.permute.xlu1 %524 }
 0x667   :  { %v527_v33 = vsel %vm59_vm1, %v521_v31, %v525_v32 }
 0x668   :  { %v529_v34 = vsel %vm528_vm5, %v527_v33, %v525_v32 }
 0x669   :  { %v530_v35 = vsel %vm128_vm2, %v529_v34, 0.0 }
 0x66a   :  { %531 = vst [vmem:[#allocation4] sm:$0xff] %v530_v35 }
 0x66b   :  { %715 = shalt.err (!%p712_p12)
}
 0x66c   :  { %s716_s19 = scalar_lea.hbm %s942_s12, 128 }
 0x66d   :  { %p717_p13 = scmp.ne.s32.totalorder %s942_s12, %s716_s19  ;;  %p720_p0 = scmp.lt.u32.totalorder %s716_s19, %s942_s12 }
 0x66f   :  { %p722_p1 = pnand %p720_p0, %p717_p13 }
 0x671   :  { %725 = shalt.err (!%p722_p1)
}
 0x672   :  { %551 = dma.vmem_to_hbm [thread:$0]  %s549_s17, 128, %s942_s12, [#allocation5]  }
 0x673   :  { %726 = dma.done.wait [#allocation3], 128  }
 0x674   :  { %727 = vsyncadd [#allocation3], 4294967168 }
 0x675   :  { %728 = dma.done.wait [#allocation5], 128  }
 0x676   :  { %729 = vsyncadd [#allocation5], 4294967168 }
 0x677   :  { %558 = vsyncpa [#allocation3], 1 }
 0x678   :  { %559 = vsyncpa [#allocation5], 1 }

</bundles_post_ra>
